<compile_context>
chip_gen: v5e
topology: v5e:2x2
jax: 0.10.0
libtpu: 0.0.40
codegen_flags: <defaults>
</compile_context>

<pallas_src>
import jax
import jax.numpy as jnp
from jax.experimental import pallas as pl
from jax.experimental.pallas import tpu as pltpu

EPS = 1e-12                     # F.normalize default eps
_SUBLANE = 8
_MIN_SPLIT_ROWS = 512           # don't shrink tiles below this just to add steps
_NUM_CORES = 2                  # v7x megacore; harmless on single-TC parts
_TARGET_STEPS_PER_CORE = 4      # enough steps for prefetch/compute overlap


def _round_up(v: int, m: int) -> int:
    return ((v + m - 1) // m) * m


def _vmem_budgets() -> tuple[int, int]:
    """(pipeline_block_budget_bytes, vmem_limit_bytes), generation-aware."""
    try:
        cap = pltpu.get_tpu_info().vmem_capacity_bytes
    except Exception:
        cap = 64 * 1024 * 1024                       # conservative v7x fallback
    vmem_limit = min(cap * 3 // 4, 96 * 1024 * 1024)  # ~96 MiB v5e/v6e, ~48 MiB v7x
    return vmem_limit // 2, vmem_limit                # half of it for pipeline blocks


def _choose_row_tile(n_rows: int, feat: int, itemsize: int,
                     pipeline_budget: int) -> int:
    """Largest row tile whose pipeline + compute VMEM fits the budget, with an
    even, overlap-friendly grid step count for large N."""
    # x, msg, out double-buffered in native dtype (3 * 2) plus the in-kernel
    # f32 working copies of x/msg and the f32 output of the multiply (3 * 4B),
    # charged at full width to be safe for bf16 inputs.
    per_row = 3 * 2 * feat * itemsize + 3 * feat * 4
    max_tile = max(_SUBLANE, (pipeline_budget // per_row) // _SUBLANE * _SUBLANE)

    if n_rows < _NUM_CORES * _MIN_SPLIT_ROWS:
        # Not enough work to bother splitting across cores: one (possibly
        # partial, write-masked) block, or whatever the budget forces.
        return min(max_tile, _round_up(n_rows, _SUBLANE))

    min_steps = pl.cdiv(n_rows, max_tile)              # forced by the VMEM budget
    max_steps = max(1, n_rows // _MIN_SPLIT_ROWS)      # keep tiles >= ~512 rows
    steps = min(_NUM_CORES * _TARGET_STEPS_PER_CORE, max_steps)
    steps = max(steps, min_steps)
    steps = _round_up(steps, _NUM_CORES)               # even -> both v7x TCs busy
    tile = _round_up(pl.cdiv(n_rows, steps), _SUBLANE)
    return max(_SUBLANE, min(tile, max_tile))


def _msg_norm_kernel(scale_ref, x_ref, msg_ref, out_ref):
    m = msg_ref[...]
    x = x_ref[...]

    # Row-wise sums of squares along the feature (lane) axis -> XLU reduction,
    # accumulated in f32 regardless of input dtype.
    m32 = m.astype(jnp.float32)
    x32 = x.astype(jnp.float32)
    msg_sumsq = jnp.sum(m32 * m32, axis=-1, keepdims=True)
    x_sumsq = jnp.sum(x32 * x32, axis=-1, keepdims=True)

    # Per-row factor s * ||x|| / max(||m||, eps): exact f32 ops on [tile, 1]
    # (narrow, negligible cost; avoids EUP-approximation precision concerns).
    msg_norm = jnp.maximum(jnp.sqrt(msg_sumsq), EPS)
    factor = (jnp.sqrt(x_sumsq) * scale_ref[0]) / msg_norm

    # Single full-width broadcast multiply, kept in the msg dtype so bf16
    # inputs never materialize a full f32 copy of the tile.
    out_ref[...] = (m * factor.astype(m.dtype)).astype(out_ref.dtype)


def message_norm(x: jax.Array, msg: jax.Array, scale: jax.Array,
                 *, row_tile: int | None = None) -> jax.Array:
    """x, msg: [N, F]; scale: scalar or [1]. Returns [N, F] in msg's dtype."""
    assert x.shape == msg.shape and x.ndim == 2
    n, f = x.shape
    out_dtype = msg.dtype

    scale = jnp.asarray(scale, dtype=jnp.float32).reshape((1,))
    pipeline_budget, vmem_limit = _vmem_budgets()
    itemsize = jnp.dtype(msg.dtype).itemsize
    tile = row_tile if row_tile is not None else _choose_row_tile(
        n, f, itemsize, pipeline_budget)
    grid = (pl.cdiv(n, tile),)   # no N-padding: boundary block is masked on write

    return pl.pallas_call(
        _msg_norm_kernel,
        out_shape=jax.ShapeDtypeStruct((n, f), out_dtype),
        grid_spec=pltpu.PrefetchScalarGridSpec(
            num_scalar_prefetch=0,
            grid=grid,
            in_specs=[
                pl.BlockSpec(memory_space=pltpu.MemorySpace.SMEM),  # scale (1,)
                pl.BlockSpec((tile, f), lambda i: (i, 0)),          # x
                pl.BlockSpec((tile, f), lambda i: (i, 0)),          # msg
            ],
            out_specs=pl.BlockSpec((tile, f), lambda i: (i, 0)),
        ),
        compiler_params=pltpu.CompilerParams(
            dimension_semantics=("parallel",),
            vmem_limit_bytes=vmem_limit),
    )(scale, x, msg)


if __name__ == "__main__":
    key = jax.random.PRNGKey(0)
    kx, km = jax.random.split(key)

    # N not a multiple of 8 and F not a multiple of 128: exercises the
    # write-masked boundary block and the full-dim (unpadded) feature axis.
    num_nodes, feat = 19, 32
    x = jax.random.normal(kx, (num_nodes, feat), dtype=jnp.float32)
    msg = jax.random.normal(km, (num_nodes, feat), dtype=jnp.float32)

    # Parameter init matches MessageNorm.reset_parameters(): scale = 1.0
    scale = jnp.ones((1,), dtype=jnp.float32)

    out = jax.block_until_ready(message_norm(x, msg, scale))

    # Pure-JAX reference check
    msg_hat = msg / jnp.maximum(
        jnp.linalg.norm(msg, ord=2, axis=-1, keepdims=True), EPS)
    x_norm = jnp.linalg.norm(x, ord=2, axis=-1, keepdims=True)
    ref = msg_hat * x_norm * scale[0]
    assert out.shape == ref.shape and out.dtype == ref.dtype
    assert jnp.allclose(out, ref, atol=1e-5, rtol=1e-5)

    print("KERNEL_OK")
</pallas_src>

<mosaic_0001>
module attributes {stable_mosaic.version = 11 : i64} {
  func.func @_msg_norm_kernel(%arg0: i32, %arg1: memref<1xf32, #tpu.memory_space<smem>>, %arg2: memref<24x32xf32, #tpu.memory_space<vmem>>, %arg3: memref<24x32xf32, #tpu.memory_space<vmem>>, %arg4: memref<24x32xf32, #tpu.memory_space<vmem>>) attributes {dimension_semantics = [#tpu.dimension_semantics<parallel>], iteration_bounds = array<i64: 1>, scalar_prefetch = 0 : i64, scratch_operands = 0 : i64, tpu.core_type = #tpu.core_type<tc>, window_params = [{transform_indices = @transform_0, window_bounds = array<i64: 1>}, {transform_indices = @transform_1, window_bounds = array<i64: 24, 32>}, {transform_indices = @transform_2, window_bounds = array<i64: 24, 32>}, {transform_indices = @transform_3, window_bounds = array<i64: 24, 32>}]} {
    %c0 = arith.constant 0 : index
    %c0_0 = arith.constant 0 : index
    %0 = vector.load %arg3[%c0, %c0_0] : memref<24x32xf32, #tpu.memory_space<vmem>>, vector<24x32xf32>
    %c0_1 = arith.constant 0 : index
    %c0_2 = arith.constant 0 : index
    %1 = vector.load %arg2[%c0_1, %c0_2] : memref<24x32xf32, #tpu.memory_space<vmem>>, vector<24x32xf32>
    %2 = arith.mulf %0, %0 : vector<24x32xf32>
    %cst = arith.constant dense<0.000000e+00> : vector<24xf32>
    %3 = vector.multi_reduction <add>, %2, %cst [1] : vector<24x32xf32> to vector<24xf32>
    %4 = vector.shape_cast %3 : vector<24xf32> to vector<24x1xf32>
    %5 = arith.mulf %1, %1 : vector<24x32xf32>
    %cst_3 = arith.constant dense<0.000000e+00> : vector<24xf32>
    %6 = vector.multi_reduction <add>, %5, %cst_3 [1] : vector<24x32xf32> to vector<24xf32>
    %7 = vector.shape_cast %6 : vector<24xf32> to vector<24x1xf32>
    %8 = math.sqrt %4 : vector<24x1xf32>
    %cst_4 = arith.constant 9.99999996E-13 : f32
    %9 = vector.broadcast %cst_4 : f32 to vector<24x1xf32>
    %10 = arith.maximumf %8, %9 : vector<24x1xf32>
    %11 = math.sqrt %7 : vector<24x1xf32>
    %c0_5 = arith.constant 0 : index
    %12 = memref.load %arg1[%c0_5] : memref<1xf32, #tpu.memory_space<smem>>
    %13 = vector.broadcast %12 : f32 to vector<24x1xf32>
    %14 = arith.mulf %11, %13 : vector<24x1xf32>
    %15 = arith.divf %14, %10 : vector<24x1xf32>
    %16 = vector.broadcast %15 : vector<24x1xf32> to vector<24x32xf32>
    %17 = arith.mulf %0, %16 : vector<24x32xf32>
    %c0_6 = arith.constant 0 : index
    %c0_7 = arith.constant 0 : index
    %18 = vector.load %arg4[%c0_6, %c0_7] : memref<24x32xf32, #tpu.memory_space<vmem>>, vector<24x32xf32>
    tpu.vector_store %arg4[%c0_6, %c0_7], %17 {strides = array<i32>} : memref<24x32xf32, #tpu.memory_space<vmem>>, vector<24x32xf32>,
    return
  }
  func.func @transform_0(%arg0: i32) -> i32 {
    %c0_i32 = arith.constant 0 : i32
    %c0_i32_0 = arith.constant 0 : i32
    return %c0_i32 : i32
  }
  func.func @transform_1(%arg0: i32) -> (i32, i32) {
    %c0_i32 = arith.constant 0 : i32
    %c0_i32_0 = arith.constant 0 : i32
    return %arg0, %c0_i32 : i32, i32
  }
  func.func @transform_2(%arg0: i32) -> (i32, i32) {
    %c0_i32 = arith.constant 0 : i32
    %c0_i32_0 = arith.constant 0 : i32
    return %arg0, %c0_i32 : i32, i32
  }
  func.func @transform_3(%arg0: i32) -> (i32, i32) {
    %c0_i32 = arith.constant 0 : i32
    %c0_i32_0 = arith.constant 0 : i32
    return %arg0, %c0_i32 : i32, i32
  }
}

</mosaic_0001>

<bundles_post_ra>
// kernel: tpu_custom_call.1
= control target key start
LH: loop header
LB: loop body
LE: loop exit
PB: predicated region body
PF: predicated region fallthrough
CT: control target
= control target key end

     0   :  { %9 = vsyncpa [#allocation4], 0  ;;  %s454_s0 = inlined_call_operand.<no memory space> [shape: f32[1], index: 0, kind: input, shape index: {}]   ;;  %s455_s1 = inlined_call_operand.hbm [shape: f32[19,32], index: 1, kind: input, shape index: {}]   ;;  %s456_s2 = inlined_call_operand.hbm [shape: f32[19,32], index: 2, kind: input, shape index: {}]   ;;  %s457_s3 = inlined_call_operand.hbm [shape: f32[19,32], index: 3, kind: output, shape index: {}]  }
   0x1   :  { %10 = vsyncpa [#allocation7], 0 }
   0x2   :  { %11 = vsyncpa [#allocation5], 0  ;;  %s18_s14 = sshll.u32 %s455_s1, 4  ;;  %s331_s15 = smov [#allocation3]   ;;  %s19_s14 = int_to_ptr.hbm [resolvable:$true] %s18_s14 }
   0x3   :  { %s20_s16 = sshll.u32 %s331_s15, 4  ;;  %s31_s19 = sshll.u32 %s456_s2, 4  ;;  %s21_s16 = int_to_ptr.vmem [resolvable:$true] %s20_s16  ;;  %s32_s19 = int_to_ptr.hbm [resolvable:$true] %s31_s19 }
   0x4   :  { %s332_s20 = smov 128   ;;  %s333_s21 = smov 8  }
   0x5   :  { %26 = dma.hbm_to_vmem [thread:$0]  %s19_s14, 384, %s21_s16, [#allocation4], %s332_s20, %s332_s20, %s333_s21  }
   0x6   :  { %s334_s22 = smov [#allocation6]  }
   0x7   :  { %s33_s23 = sshll.u32 %s334_s22, 4  ;;  %s34_s23 = int_to_ptr.vmem [resolvable:$true] %s33_s23 }
   0x8   :  { %39 = dma.hbm_to_vmem [thread:$0]  %s32_s19, 384, %s34_s23, [#allocation7], %s332_s20, %s332_s20, %s333_s21  }
   0x9   :  { %325 = dma.done.wait [#allocation4], 384  }
   0xa   :  { %326 = vsyncadd [#allocation4], 4294966912 }
   0xb   :  { %327 = dma.done.wait [#allocation7], 384  }
   0xc   :  { %328 = vsyncadd [#allocation7], 4294966912  ;;  %v52_v0 = vld [vmem:[#allocation3 + $0x8] sm:$0xff]  ;;  %vm57_vm0 = vcmask 261120   ;;  %v370_v2 = vld [vmem:[#allocation6] sm:$0xff]  ;;  %s216_s27 = sshll.u32 %s457_s3, 4  ;;  %s217_s27 = int_to_ptr.hbm [resolvable:$true] %s216_s27 }
   0xd   :  { %v368_v1 = vld [vmem:[#allocation6 + $0x10] sm:$0xff]  ;;  %v68_v3 = vmul.f32 %v52_v0, %v52_v0  ;;  %v54_v5 = vmul.f32 %v370_v2, %v370_v2  ;;  %v53_v6 = vld [vmem:[#allocation3 + $0x10] sm:$0xff]  ;;  %v51_v7 = vld [vmem:[#allocation3] sm:$0xff] }
   0xe   :  { %v56_v4 = vmul.f32 %v368_v1, %v368_v1  ;;  %v379_v11 = vld [vmem:[#allocation6 + $0x8] sm:$0xff]  ;;  %v69_v12 = vmul.f32 %v53_v6, %v53_v6  ;;  %v67_v13 = vmul.f32 %v51_v7, %v51_v7  ;;  %v410_v6 = vstv %s454_s0  ;;  %s335_s0 = smov [#allocation8]  }
   0xf   :  { %v73_v8 = vsel %vm57_vm0, %v68_v3, 0.0  ;;  %v58_v10 = vsel %vm57_vm0, %v54_v5, 0.0  ;;  %v55_v14 = vmul.f32 %v379_v11, %v379_v11  ;;  %s214_s24 = sshll.u32 %s335_s0, 4  ;;  %s215_s24 = int_to_ptr.vmem [resolvable:$true] %s214_s24 }
  0x10   :  { %v64_v9 = vsel %vm57_vm0, %v56_v4, 0.0  ;;  %74 = vadd.xlane.f32.xlu2 %v73_v8  ;;  %59 = vadd.xlane.f32.xlu0 %v58_v10  ;;  %v76_v15 = vsel %vm57_vm0, %v69_v12, 0.0  ;;  %v70_v16 = vsel %vm57_vm0, %v67_v13, 0.0 }
  0x11   :  { %65 = vadd.xlane.f32.xlu1 %v64_v9  ;;  %v61_v17 = vsel %vm57_vm0, %v55_v14, 0.0 }
  0x18   :  { %77 = vadd.xlane.f32.xlu2 %v76_v15  ;;  %62 = vadd.xlane.f32.xlu0 %v61_v17 }
  0x19   :  { %71 = vadd.xlane.f32.xlu1 %v70_v16 }
  0x83   :  { %v386_v18 = vpop.xlane.xlu2 %74  ;;  %v60_v20 = vpop.xlane.xlu0 %59 }
  0x84   :  { %v66_v19 = vpop.xlane.xlu1 %65  ;;  %vm86_vm3 = vcmp.eq.f32.partialorder %v60_v20, inf  ;;  %vm88_vm4 = vcmp.eq.f32.partialorder %v60_v20, 0.0  ;;  %v89_v51 = vand.u32 2147483648, %v60_v20  ;;  %vm137_vm13 = vcmp.eq.f32.partialorder %v386_v18, inf }
  0x85   :  { %235 = vrsqrt.f32 %v66_v19  ;;  %vm110_vm1 = vcmp.eq.f32.partialorder %v66_v19, inf  ;;  %vm112_vm2 = vcmp.eq.f32.partialorder %v66_v19, 0.0  ;;  %v113_v45 = vand.u32 2147483648, %v66_v19 }
  0x86   :  { %237 = vrsqrt.f32 %v60_v20 }
  0x87   :  { %239 = vrsqrt.f32 %v386_v18 }
  0x8b   :  { %v236_v21 = vpop.eup %235  ;;  %v389_v22 = vpop.xlane.xlu2 %77 }
  0x8c   :  { %v391_v23 = vpop.xlane.xlu1 %71  ;;  %v238_v24 = vpop.eup %237  ;;  %v104_v25 = vmul.f32 %v236_v21, %v66_v19  ;;  %241 = vrsqrt.f32 %v389_v22  ;;  %vm149_vm6 = vcmp.eq.f32.partialorder %v389_v22, inf  ;;  %vm151_vm8 = vcmp.eq.f32.partialorder %v389_v22, 0.0 }
  0x8d   :  { %v394_v26 = vpop.xlane.xlu0 %62  ;;  %v80_v27 = vmul.f32 %v238_v24, %v60_v20  ;;  %243 = vrsqrt.f32 %v391_v23  ;;  %v398_v31 = vpop.eup %239  ;;  %vm125_vm9 = vcmp.eq.f32.partialorder %v391_v23, inf  ;;  %vm127_vm10 = vcmp.eq.f32.partialorder %v391_v23, 0.0 }
  0x8e   :  { %v105_v28 = vmul.f32 %v236_v21, %v104_v25  ;;  %245 = vrsqrt.f32 %v394_v26  ;;  %v131_v41 = vmul.f32 %v398_v31, %v386_v18  ;;  %vm98_vm5 = vcmp.eq.f32.partialorder %v394_v26, inf }
  0x8f   :  { %v81_v29 = vmul.f32 %v238_v24, %v80_v27  ;;  %v101_v10 = vand.u32 2147483648, %v394_v26  ;;  %vm100_vm7 = vcmp.eq.f32.partialorder %v394_v26, 0.0  ;;  %v128_v27 = vand.u32 2147483648, %v391_v23 }
  0x90   :  { %v106_v30 = vmul.f32 0.5, %v105_v28  ;;  %v132_v54 = vmul.f32 %v398_v31, %v131_v41 }
  0x91   :  { %v82_v32 = vmul.f32 0.5, %v81_v29 }
  0x92   :  { %v242_v33 = vpop.eup %241  ;;  %v107_v34 = vsub.f32 1.5, %v106_v30  ;;  %v133_v0 = vmul.f32 0.5, %v132_v54 }
  0x93   :  { %v244_v35 = vpop.eup %243  ;;  %v83_v36 = vsub.f32 1.5, %v82_v32  ;;  %v143_v37 = vmul.f32 %v242_v33, %v389_v22 }
  0x94   :  { %v108_v38 = vmul.f32 %v236_v21, %v107_v34  ;;  %v119_v39 = vmul.f32 %v244_v35, %v391_v23  ;;  %v246_v40 = vpop.eup %245  ;;  %v134_v8 = vsub.f32 1.5, %v133_v0 }
  0x95   :  { %v84_v42 = vmul.f32 %v238_v24, %v83_v36  ;;  %v144_v43 = vmul.f32 %v242_v33, %v143_v37  ;;  %v92_v47 = vmul.f32 %v246_v40, %v394_v26 }
  0x96   :  { %v109_v44 = vmul.f32 %v108_v38, %v66_v19  ;;  %v120_v46 = vmul.f32 %v244_v35, %v119_v39  ;;  %v135_v24 = vmul.f32 %v398_v31, %v134_v8 }
  0x97   :  { %v85_v48 = vmul.f32 %v84_v42, %v60_v20  ;;  %v145_v49 = vmul.f32 0.5, %v144_v43  ;;  %v93_v53 = vmul.f32 %v246_v40, %v92_v47 }
  0x98   :  { %v111_v50 = vsel %vm110_vm1, %v66_v19, %v109_v44  ;;  %v121_v52 = vmul.f32 0.5, %v120_v46  ;;  %v152_v19 = vand.u32 2147483648, %v389_v22  ;;  %v136_v39 = vmul.f32 %v135_v24, %v386_v18 }
  0x99   :  { %v114_v55 = vsel %vm112_vm2, %v113_v45, %v111_v50  ;;  %v87_v56 = vsel %vm86_vm3, %v60_v20, %v85_v48  ;;  %v146_v57 = vsub.f32 1.5, %v145_v49  ;;  %v94_v61 = vmul.f32 0.5, %v93_v53 }
  0x9a   :  { %v117_v58 = vmax.f32 %v114_v55, 1e-12  ;;  %v90_v59 = vsel %vm88_vm4, %v89_v51, %v87_v56  ;;  %v122_v60 = vsub.f32 1.5, %v121_v52  ;;  %v140_v50 = vand.u32 2147483648, %v386_v18 }
  0x9b   :  { %v115_v62 = vmax.f32 %v90_v59, 1e-12  ;;  %v95_v63 = vsub.f32 1.5, %v94_v61  ;;  %v147_v3 = vmul.f32 %v242_v33, %v146_v57  ;;  %v138_v52 = vsel %vm137_vm13, %v386_v18, %v136_v39 }
  0x9c   :  { %247 = vrcp.f32 %v117_v58  ;;  %v123_v4 = vmul.f32 %v244_v35, %v122_v60  ;;  %v200_v30 = vand.u32 2147483648, %v117_v58  ;;  %v198_v34 = vand.u32 2147483647, %v117_v58 }
  0x9d   :  { %249 = vrcp.f32 %v115_v62  ;;  %v96_v5 = vmul.f32 %v246_v40, %v95_v63  ;;  %v148_v9 = vmul.f32 %v147_v3, %v389_v22  ;;  %v170_v32 = vand.u32 2147483648, %v115_v62 }
  0x9e   :  { %v124_v13 = vmul.f32 %v123_v4, %v391_v23  ;;  %v168_v31 = vand.u32 2147483647, %v115_v62  ;;  %vm194_vm14 = vweird.f32 %v117_v58  ;;  %vm164_vm15 = vweird.f32 %v115_v62 }
  0x9f   :  { %v97_v7 = vmul.f32 %v96_v5, %v394_v26  ;;  %v150_v25 = vsel %vm149_vm6, %v389_v22, %v148_v9  ;;  %v201_v41 = vor.u32 1.1754944e-38, %v200_v30  ;;  %v171_v22 = vor.u32 1.1754944e-38, %v170_v32 }
  0xa0   :  { %v126_v28 = vsel %vm125_vm9, %v391_v23, %v124_v13  ;;  %v153_v35 = vsel %vm151_vm8, %v152_v19, %v150_v25  ;;  %vm199_vm3 = vcmp.eq.f32.partialorder %v198_v34, 8.507059e+37  ;;  %vm169_vm4 = vcmp.eq.f32.partialorder %v168_v31, 8.507059e+37 }
  0xa1   :  { %v99_v14 = vsel %vm98_vm5, %v394_v26, %v97_v7  ;;  %v129_v37 = vsel %vm127_vm10, %v128_v27, %v126_v28  ;;  %v158_v42 = vmul.f32 %v410_v6, %v153_v35  ;;  %vm139_vm5 = vcmp.eq.f32.partialorder %v386_v18, 0.0 }
  0xa2   :  { %v248_v12 = vpop.eup %247  ;;  %v102_v16 = vsel %vm100_vm7, %v101_v10, %v99_v14  ;;  %v156_v45 = vmul.f32 %v410_v6, %v129_v37  ;;  %v141_v59 = vsel %vm139_vm5, %v140_v50, %v138_v52 }
  0xa3   :  { %v250_v15 = vpop.eup %249  ;;  %v190_v17 = vmul.f32 %v248_v12, %v117_v58  ;;  %v116_v20 = vmax.f32 %v102_v16, 1e-12  ;;  %vm195_vm11 = vweird.f32 %v248_v12 }
  0xa4   :  { %v160_v21 = vmul.f32 %v250_v15, %v115_v62  ;;  %vm165_vm12 = vweird.f32 %v250_v15  ;;  %vm196_vm1 = vmor %vm194_vm14, %vm195_vm11  ;;  %v157_v62 = vmul.f32 %v410_v6, %v141_v59 }
  0xa5   :  { %v191_v26 = vsub.f32 1.0, %v190_v17  ;;  %251 = vrcp.f32 %v116_v20  ;;  %vm166_vm2 = vmor %vm164_vm15, %vm165_vm12  ;;  %v185_v55 = vand.u32 2147483648, %v116_v20  ;;  %v183_v58 = vand.u32 2147483647, %v116_v20 }
  0xa6   :  { %v161_v29 = vsub.f32 1.0, %v160_v21  ;;  %vm179_vm7 = vweird.f32 %v116_v20 }
  0xa7   :  { %v192_v33 = vmul.f32 %v248_v12, %v191_v26  ;;  %v186_v61 = vor.u32 1.1754944e-38, %v185_v55  ;;  %vm184_vm9 = vcmp.eq.f32.partialorder %v183_v58, 8.507059e+37 }
  0xa8   :  { %v162_v36 = vmul.f32 %v250_v15, %v161_v29 }
  0xa9   :  { %v193_v38 = vadd.f32 %v248_v12, %v192_v33 }
  0xaa   :  { %v163_v40 = vadd.f32 %v250_v15, %v162_v36 }
  0xab   :  { %v197_v43 = vsel %vm196_vm1, %v248_v12, %v193_v38  ;;  %v252_v44 = vpop.eup %251 }
  0xac   :  { %v167_v46 = vsel %vm166_vm2, %v250_v15, %v163_v40  ;;  %v202_v23 = vsel %vm199_vm3, %v201_v41, %v197_v43  ;;  %v175_v47 = vmul.f32 %v252_v44, %v116_v20  ;;  %vm180_vm6 = vweird.f32 %v252_v44 }
  0xad   :  { %v172_v48 = vsel %vm169_vm4, %v171_v22, %v167_v46  ;;  %v203_v49 = vmul.f32 %v202_v23, %v158_v42  ;;  %vm181_vm8 = vmor %vm179_vm7, %vm180_vm6 }
  0xae   :  { %v173_v51 = vmul.f32 %v172_v48, %v156_v45  ;;  %v176_v53 = vsub.f32 1.0, %v175_v47 }
  0xaf   :  { %v206_v54 = vmul.f32 %v203_v49, %v368_v1 }
  0xb0   :  { %v204_v56 = vmul.f32 %v173_v51, %v370_v2  ;;  %v177_v57 = vmul.f32 %v252_v44, %v176_v53 }
  0xb1   :  { %209 = vst.msk [vmem:[#allocation8 + $0x10] sm:$0xff] %vm57_vm0, %v206_v54 }
  0xb2   :  { %207 = vst.msk [vmem:[#allocation8] sm:$0xff] %vm57_vm0, %v204_v56  ;;  %v178_v60 = vadd.f32 %v252_v44, %v177_v57 }
  0xb4   :  { %v182_v1 = vsel %vm181_vm8, %v252_v44, %v178_v60 }
  0xb5   :  { %v187_v63 = vsel %vm184_vm9, %v186_v61, %v182_v1 }
  0xb6   :  { %v188_v2 = vmul.f32 %v187_v63, %v157_v62 }
  0xb8   :  { %v205_v18 = vmul.f32 %v188_v2, %v379_v11 }
  0xba   :  { %208 = vst.msk [vmem:[#allocation8 + $0x8] sm:$0xff] %vm57_vm0, %v205_v18 }
  0xbb   :  { %222 = dma.vmem_to_hbm [thread:$0]  %s215_s24, 384, %s217_s27, [#allocation5], %s332_s20, %s332_s20, %s333_s21  }
  0xbc   :  { %329 = dma.done.wait [#allocation5], 384  }
  0xbd   :  { %330 = vsyncadd [#allocation5], 4294966912 }
  0xbe   :  { %227 = vsyncpa [#allocation4], 1 }
  0xbf   :  { %228 = vsyncpa [#allocation7], 1 }
  0xc0   :  { %229 = vsyncpa [#allocation5], 1 }

</bundles_post_ra>
